<compile_context>
chip_gen: v5e
topology: v5e:2x2
jax: 0.10.0
libtpu: 0.0.40
codegen_flags: <defaults>
</compile_context>

<pallas_src>
import functools

import jax
import jax.numpy as jnp
from jax.experimental import pallas as pl
from jax.experimental.pallas import tpu as pltpu


def mlp_kernel(x_ref, c_ref, b3_ref, o_ref, *, k, act_dtype, mxu_dtype):
    # Packed constants: columns [0:k] = w2 (20,20), then w1 | b1 | b2 | w3^T,
    # each a (20, 1) column. Static lane slices of a single VMEM tile.
    w2 = c_ref[:, 0:k]
    w1 = c_ref[:, k:k + 1]
    b1 = c_ref[:, k + 1:k + 2]
    b2 = c_ref[:, k + 2:k + 3]
    w3t = c_ref[:, k + 3:k + 4]

    x = x_ref[...]                                         # (1, BM) f32

    # Layer 1: Linear(1, 20). K=1 -> VPU broadcast mul-add, no MXU push.
    h1 = jnp.tanh((w1 * x + b1).astype(act_dtype))         # (20, BM)

    # Layer 2: Linear(20, 20). MXU matmul; batch fills the N/lane dimension.
    z2 = jnp.dot(w2.astype(mxu_dtype), h1.astype(mxu_dtype),
                 preferred_element_type=jnp.float32) + b2
    h2 = jnp.tanh(z2.astype(act_dtype)).astype(jnp.float32)   # (20, BM) f32

    # Layer 3: Linear(20, 1). N=1 -> elementwise mul + sublane reduce (XLU).
    o_ref[...] = jnp.sum(w3t * h2, axis=0, keepdims=True) + b3_ref[0]


def _device_defaults():
    """Returns (batch_tile, vmem_limit_bytes, act_dtype, mxu_dtype) per TPU gen."""
    try:
        kind = jax.devices()[0].device_kind.lower()
    except Exception:
        kind = ""
    if "v7" in kind:        # 64 MiB VMEM, 2 TC/chip, bf16 EUP/VPU
        return 32768, 48 * 1024 * 1024, jnp.bfloat16, jnp.bfloat16
    if "v6" in kind:        # 128 MiB VMEM, bf16 EUP/VPU
        return 65536, 96 * 1024 * 1024, jnp.bfloat16, jnp.bfloat16
    if "v5" in kind or "v4" in kind:   # 128 MiB VMEM, no bf16 EUP -> f32 tanh
        return 65536, 96 * 1024 * 1024, jnp.float32, jnp.bfloat16
    # Unknown / older generation: conservative tile, default VMEM cap, pure f32.
    return 8192, None, jnp.float32, jnp.float32


def t20_t20_forward(x, params, *, block_m=None, act_dtype=None, mxu_dtype=None,
                    vmem_limit_bytes=None):
    """x: (N, 1) float32. params in PyTorch layout:
       w1 (20,1), b1 (20,), w2 (20,20), b2 (20,), w3 (1,20), b3 (1,)."""
    w1, b1, w2, b2, w3, b3 = params
    h1_out = w1.shape[0]           # 20
    h2_out, h2_in = w2.shape       # 20, 20
    assert h1_out == h2_in == h2_out == w3.shape[1]
    n = x.shape[0]

    d_bm, d_vmem, d_act, d_mxu = _device_defaults()
    block_m = d_bm if block_m is None else int(block_m)
    vmem_limit_bytes = d_vmem if vmem_limit_bytes is None else vmem_limit_bytes
    act_dtype = d_act if act_dtype is None else act_dtype
    mxu_dtype = d_mxu if mxu_dtype is None else mxu_dtype

    # Batch tile: lane aligned, big enough to amortize the ~0.35 us/step
    # pipeline cost, capped near n/2 so the grid keeps >= 2 steps when there
    # is enough work. No host-side padding: the ragged last block is masked
    # by Pallas.
    lanes = pl.cdiv(n, 128) * 128
    half = pl.cdiv(pl.cdiv(n, 2), 128) * 128
    bm = max(128, min(block_m, lanes, max(half, 128)))
    grid = (pl.cdiv(n, bm),)

    # Batch on lanes: (N, 1) -> (1, N)  (free reshape of contiguous data).
    x_row = jnp.asarray(x, jnp.float32).reshape(1, n)

    # Pack all (20, *) constants into one array: one DMA / one VMEM tile.
    f32 = jnp.float32
    cpack = jnp.concatenate(
        [jnp.asarray(w2, f32),                        # (20, 20)
         jnp.asarray(w1, f32).reshape(h1_out, 1),     # (20, 1)
         jnp.asarray(b1, f32).reshape(h1_out, 1),
         jnp.asarray(b2, f32).reshape(h2_out, 1),
         jnp.asarray(w3, f32).reshape(h2_out, 1)],    # w3^T
        axis=1)                                       # (20, 24)
    b3_s = jnp.asarray(b3, f32).reshape(1)            # scalar bias -> SMEM

    kernel = functools.partial(mlp_kernel, k=h2_in,
                               act_dtype=act_dtype, mxu_dtype=mxu_dtype)

    batch_map = lambda i: (0, i)
    const_map = lambda i: (0, 0)

    out_row = pl.pallas_call(
        kernel,
        out_shape=jax.ShapeDtypeStruct((1, n), jnp.float32),
        grid_spec=pltpu.PrefetchScalarGridSpec(
            num_scalar_prefetch=0,
            grid=grid,
            in_specs=[
                pl.BlockSpec((1, bm), batch_map),       # x (batch on lanes)
                pl.BlockSpec(cpack.shape, const_map),   # packed constants
                pl.BlockSpec(memory_space=pltpu.MemorySpace.SMEM),  # b3 scalar
            ],
            out_specs=pl.BlockSpec((1, bm), batch_map),
        ),
        compiler_params=pltpu.CompilerParams(
            dimension_semantics=("parallel",),
            vmem_limit_bytes=vmem_limit_bytes,
        ),
    )(x_row, cpack, b3_s)

    return out_row.reshape(n, 1)


def init_params(key):
    # Mimics nn.Linear's U(-1/sqrt(fan_in), 1/sqrt(fan_in)), PyTorch (out,in) layout.
    k1, k2, k3, k4, k5, k6 = jax.random.split(key, 6)

    def unif(k, shape, fan_in):
        bound = 1.0 / jnp.sqrt(jnp.float32(fan_in))
        return jax.random.uniform(k, shape, jnp.float32, -bound, bound)

    w1 = unif(k1, (20, 1), 1)      # Linear(1, 20).weight
    b1 = unif(k2, (20,), 1)
    w2 = unif(k3, (20, 20), 20)    # Linear(20, 20).weight
    b2 = unif(k4, (20,), 20)
    w3 = unif(k5, (1, 20), 20)     # Linear(20, 1).weight
    b3 = unif(k6, (1,), 20)
    return (w1, b1, w2, b2, w3, b3)


def reference_forward(x, params):
    w1, b1, w2, b2, w3, b3 = params
    h1 = jnp.tanh(x @ w1.T + b1)
    h2 = jnp.tanh(h1 @ w2.T + b2)
    return h2 @ w3.T + b3


if __name__ == "__main__":
    key = jax.random.PRNGKey(0)
    kp, kx = jax.random.split(key)
    params = init_params(kp)

    # Small ragged batch: 2000 -> two grid steps of 1024 lanes with a masked
    # tail (exercises the no-pad path and gives both v7x TensorCores work).
    N = 2000
    x = jax.random.normal(kx, (N, 1), jnp.float32)
    ref = reference_forward(x, params)

    # Bit-faithful f32 path: must match the PyTorch-equivalent reference.
    out = t20_t20_forward(x, params, act_dtype=jnp.float32,
                          mxu_dtype=jnp.float32)
    out = jax.block_until_ready(out)
    assert out.shape == (N, 1)
    assert jnp.allclose(out, ref, atol=1e-5, rtol=1e-5), "f32 mismatch vs reference"

    # Per-generation fast path (bf16 tanh / bf16 MXU where supported); looser
    # tolerance since bf16 rounding introduces ~1e-3-level error.
    out_fast = jax.block_until_ready(t20_t20_forward(x, params))
    assert out_fast.shape == (N, 1)
    assert jnp.allclose(out_fast, ref, atol=5e-2, rtol=5e-2), "fast-path mismatch"

    print("KERNEL_OK")
</pallas_src>

<mosaic_0001>
module attributes {stable_mosaic.version = 11 : i64} {
  func.func @mlp_kernel(%arg0: i32, %arg1: memref<1x1024xf32, #tpu.memory_space<vmem>>, %arg2: memref<20x24xf32, #tpu.memory_space<vmem>>, %arg3: memref<1xf32, #tpu.memory_space<smem>>, %arg4: memref<1x1024xf32, #tpu.memory_space<vmem>>) attributes {dimension_semantics = [#tpu.dimension_semantics<parallel>], iteration_bounds = array<i64: 2>, scalar_prefetch = 0 : i64, scratch_operands = 0 : i64, tpu.core_type = #tpu.core_type<tc>, window_params = [{transform_indices = @transform_0, window_bounds = array<i64: 1, 1024>}, {pipeline_mode = #tpu.pipeline_mode<synchronous>, transform_indices = @transform_1, window_bounds = array<i64: 20, 24>}, {transform_indices = @transform_2, window_bounds = array<i64: 1>}, {transform_indices = @transform_3, window_bounds = array<i64: 1, 1024>}]} {
    %c0 = arith.constant 0 : index
    %c0_0 = arith.constant 0 : index
    %0 = vector.load %arg2[%c0, %c0_0] : memref<20x24xf32, #tpu.memory_space<vmem>>, vector<20x20xf32>
    %c0_1 = arith.constant 0 : index
    %c20 = arith.constant 20 : index
    %1 = vector.load %arg2[%c0_1, %c20] : memref<20x24xf32, #tpu.memory_space<vmem>>, vector<20x1xf32>
    %c0_2 = arith.constant 0 : index
    %c21 = arith.constant 21 : index
    %2 = vector.load %arg2[%c0_2, %c21] : memref<20x24xf32, #tpu.memory_space<vmem>>, vector<20x1xf32>
    %c0_3 = arith.constant 0 : index
    %c22 = arith.constant 22 : index
    %3 = vector.load %arg2[%c0_3, %c22] : memref<20x24xf32, #tpu.memory_space<vmem>>, vector<20x1xf32>
    %c0_4 = arith.constant 0 : index
    %c23 = arith.constant 23 : index
    %4 = vector.load %arg2[%c0_4, %c23] : memref<20x24xf32, #tpu.memory_space<vmem>>, vector<20x1xf32>
    %c0_5 = arith.constant 0 : index
    %c0_6 = arith.constant 0 : index
    %5 = vector.load %arg1[%c0_5, %c0_6] : memref<1x1024xf32, #tpu.memory_space<vmem>>, vector<1x1024xf32>
    %6 = vector.broadcast %1 : vector<20x1xf32> to vector<20x1024xf32>
    %7 = vector.broadcast %5 : vector<1x1024xf32> to vector<20x1024xf32>
    %8 = arith.mulf %6, %7 : vector<20x1024xf32>
    %9 = vector.broadcast %2 : vector<20x1xf32> to vector<20x1024xf32>
    %10 = arith.addf %8, %9 : vector<20x1024xf32>
    %11 = math.tanh %10 : vector<20x1024xf32>
    %cst = arith.constant dense<0.000000e+00> : vector<20x1024xf32>
    %12 = tpu.matmul %0, %11, %cst {dimension_numbers = #tpu.dot_dimension_numbers<[1], [0], [0], [1], [0, 0, 1, 1], [], []>} : vector<20x20xf32>, vector<20x1024xf32>, vector<20x1024xf32> -> vector<20x1024xf32>
    %13 = vector.broadcast %3 : vector<20x1xf32> to vector<20x1024xf32>
    %14 = arith.addf %12, %13 : vector<20x1024xf32>
    %15 = math.tanh %14 : vector<20x1024xf32>
    %16 = vector.broadcast %4 : vector<20x1xf32> to vector<20x1024xf32>
    %17 = arith.mulf %16, %15 : vector<20x1024xf32>
    %cst_7 = arith.constant dense<0.000000e+00> : vector<1024xf32>
    %18 = vector.multi_reduction <add>, %17, %cst_7 [0] : vector<20x1024xf32> to vector<1024xf32>
    %19 = vector.shape_cast %18 : vector<1024xf32> to vector<1x1024xf32>
    %c0_8 = arith.constant 0 : index
    %20 = memref.load %arg3[%c0_8] : memref<1xf32, #tpu.memory_space<smem>>
    %21 = vector.broadcast %20 : f32 to vector<1x1024xf32>
    %22 = arith.addf %19, %21 : vector<1x1024xf32>
    %c0_9 = arith.constant 0 : index
    %c0_10 = arith.constant 0 : index
    %23 = vector.load %arg4[%c0_9, %c0_10] : memref<1x1024xf32, #tpu.memory_space<vmem>>, vector<1x1024xf32>
    tpu.vector_store %arg4[%c0_9, %c0_10], %22 {strides = array<i32>} : memref<1x1024xf32, #tpu.memory_space<vmem>>, vector<1x1024xf32>,
    return
  }
  func.func @transform_0(%arg0: i32) -> (i32, i32) {
    %c0_i32 = arith.constant 0 : i32
    %c0_i32_0 = arith.constant 0 : i32
    return %c0_i32, %arg0 : i32, i32
  }
  func.func @transform_1(%arg0: i32) -> (i32, i32) {
    %c0_i32 = arith.constant 0 : i32
    %c0_i32_0 = arith.constant 0 : i32
    %c0_i32_1 = arith.constant 0 : i32
    return %c0_i32, %c0_i32_0 : i32, i32
  }
  func.func @transform_2(%arg0: i32) -> i32 {
    %c0_i32 = arith.constant 0 : i32
    %c0_i32_0 = arith.constant 0 : i32
    return %c0_i32 : i32
  }
  func.func @transform_3(%arg0: i32) -> (i32, i32) {
    %c0_i32 = arith.constant 0 : i32
    %c0_i32_0 = arith.constant 0 : i32
    return %c0_i32, %arg0 : i32, i32
  }
}

</mosaic_0001>

<bundles_post_ra>
// kernel: tpu_custom_call.1
= control target key start
LH: loop header
LB: loop body
LE: loop exit
PB: predicated region body
PF: predicated region fallthrough
CT: control target
= control target key end

     0   :  { %s1559_s0 = inlined_call_operand.hbm [shape: f32[1,2000], index: 0, kind: input, shape index: {}]   ;;  %s1560_s1 = inlined_call_operand.hbm [shape: f32[20,24], index: 1, kind: input, shape index: {}]   ;;  %s1561_s2 = inlined_call_operand.<no memory space> [shape: f32[1], index: 2, kind: input, shape index: {}]   ;;  %s1562_s3 = inlined_call_operand.hbm [shape: f32[1,2000], index: 3, kind: output, shape index: {}]  }
   0x1   :  { %8 = sst [smem:[#allocation2]] %s1561_s2 }
   0x2   :  { %9 = vsyncpa [#allocation4], 0 }
   0x3   :  { %11 = vsyncpa [#allocation4 + $0x1], 0 }
   0x4   :  { %12 = vsyncpa [#allocation7], 0 }
   0x5   :  { %13 = vsyncpa [#allocation5], 0 }
   0x6   :  { %15 = vsyncpa [#allocation5 + $0x1], 0  ;;  %s1225_s14 = smov 0   ;;  %s1227_s15 = smov 0  }
   0x7   :  { %s1229_s16 = smov 0   ;;  %s1231_s17 = smov 0  }
   0x8 LB: > { %s131_s19 = sshll.u32 %s1560_s1, 4  ;;  %s1249_s20 = sadd.s32 4294967295, %s1193_s17   ;;  %s1193_s17 = sphi %s1231_s17, %s1572_s17   ;;  %s1189_s16 = sphi %s1229_s16, %s1571_s16   ;;  %s1185_s15 = sphi %s1227_s15, %s1570_s15   ;;  %s1181_s14 = sphi %s1225_s14, %s1569_s14   ;;  %s132_s19 = int_to_ptr.hbm [resolvable:$true] %s131_s19 }
   0x9   : > { %p849_p0 = scmp.ge.s32.totalorder %s1193_s17, 1  ;;  %p42_p1 = scmp.eq.s32.totalorder %s1249_s20, 0 }
   0xa   : > { %p120_p2 = scmp.lt.s32.totalorder %s1193_s17, 3  ;;  %s1195_s22 = smov [#allocation6]  }
   0xb   : > { %s133_s23 = sshll.u32 %s1195_s22, 4  ;;  %s1196_s24 = smov 128   ;;  %s134_s23 = int_to_ptr.vmem [resolvable:$true] %s133_s23 }
   0xc   : > { %p1254_p3 = pnand %p849_p0, %p120_p2  ;;  %s1197_s25 = smov 8  }
   0xd   : > { %s848_s26 = sadd.s32 4294967294, %s1193_s17   ;;  %s1265_s27 = sadd.s32 1, %s1193_s17  }
   0xe   : > { %p902_p4 = pneg %p1254_p3  ;;  %s28_s28 = sadd.s32 1, %s1189_s16 }
   0xf   : > { %s25_s29 = ssub.s32 %s1193_s17, %s1265_s27  ;;  %p35_p7 = scmp.ne.s32.totalorder %s1189_s16, %s1185_s15 }
  0x10   : > { %p903_p6 = pnand %p902_p4, %p42_p1  ;;  %p26_p8 = scmp.eq.s32.totalorder %s25_s29, 0 }
  0x11   : > { %p36_p9 = scmp.eq.s32.totalorder %s1193_s17, 0  ;;  %p41_p10 = scmp.ne.s32.totalorder %s1185_s15, %s1181_s14 }
  0x12   : > { %905 = dma.hbm_to_vmem [thread:$0]  (!%p903_p6), %s132_s19, 384, %s134_s23, [#allocation7], %s1196_s24, %s1196_s24, %s1197_s25  }
  0x13   : > { %p107_p11 = scmp.eq.s32.totalorder %s1249_s20, 1  ;;  %p1281_p12 = por %p42_p1, %p41_p10 }
  0x14   : > { %s1277_s30 = scalar_select %p26_p8, %s1189_s16, %s28_s28  }
  0x15   : > { %p1285_p13 = por %p107_p11, %p35_p7  ;;  %p113_p0 = scmp.eq.s32.totalorder %s848_s26, 1 }
  0x16   : > { %p37_p2 = por %p36_p9, %p35_p7  ;;  %s150_s6 = sand.u32 1, %s1189_s16  }
  0x17   : > { %p1290_p4 = por %p113_p0, %p41_p10  ;;  %p915_p6 = scmp.lt.s32.totalorder %s1193_s17, 2 }
  0x18   : > { %s852_s8 = sshll.u32 %s150_s6, 3  ;;  %s853_s9 = sshll.u32 %s1193_s17, 3 }
  0x19   : > { %s158_s12 = scalar_lea.hbm %s1559_s0, %s853_s9  ;;  %s154_s2 = scalar_lea.vmem [#allocation3], %s852_s8 }
  0x1a   : > { %s160_s13 = sshll.u32 %s158_s12, 4  ;;  %s162_s18 = sshll.u32 %s154_s2, 4  ;;  %s161_s13 = int_to_ptr.hbm [resolvable:$true] %s160_s13  ;;  %s163_s18 = int_to_ptr.vmem [resolvable:$true] %s162_s18 }
  0x1b   : > { %p1299_p8 = pnand %p915_p6, %p37_p2  ;;  %s151_s22 = scalar_lea.sflag [#allocation4], %s150_s6 }
  0x1c   : > { %s1093_s23 = sshra.s32 %s161_s13, 4  ;;  %s1100_s28 = scalar_lea.hbm %s1559_s0, 16  ;;  %s1094_s23 = int_to_ptr.hbm [resolvable:$true] %s1093_s23 }
  0x1d   : > { %s1095_s24 = scalar_lea.hbm %s1094_s23, 8  ;;  %p1097_p9 = pneg %p1299_p8 }
  0x1e   : > { %p1096_p7 = scmp.ne.s32.totalorder %s1094_s23, %s1095_s24  ;;  %p1101_p0 = scmp.lt.s32.totalorder %s1094_s23, %s1559_s0 }
  0x1f   : > { %p1102_p2 = scmp.lt.s32.totalorder %s1100_s28, %s1095_s24 }
  0x20   : > { %p1098_p10 = pnand %p1097_p9, %p1096_p7 }
  0x21   : > { %p1103_p6 = por %p1102_p2, %p1101_p0 }
  0x22   : > { %p1099_p11 = pneg %p1098_p10 }
  0x24   : > { %p1104_p5 = pnand %p1103_p6, %p1099_p11 }
  0x26   : > { %1107 = shalt.err (!%p1104_p5)
}
  0x27   : > { %909 = dma.hbm_to_vmem [thread:$0]  (!%p1299_p8), %s161_s13, 128, %s163_s18, %s151_s22  }
  0x28   : > { %171 = sbr.rel (%p1254_p3) target bundleno = 401 (0x191), region = 32  ;;  %s1316_s6 = sand.u32 (!%p1254_p3), 1, %s1185_s15  }
  0x29   : > { %s855_s9 = sshll.u32 (!%p1254_p3), %s1316_s6, 3  ;;  %s174_s10 = scalar_lea.sflag (!%p1254_p3), [#allocation4], %s1316_s6 }
  0x2a   : > { %s177_s11 = scalar_lea.vmem (!%p1254_p3), [#allocation3], %s855_s9 }
  0x2d   : > { %1168 = dma.done.wait (%p1281_p12), %s174_s10, 128  }
  0x2e   : > { %1170 = vsyncadd (%p1281_p12), %s174_s10, 4294967168 }
  0x2f   : > { %1172 = dma.done.wait (%p42_p1), [#allocation7], 384  }
  0x30   : > { %1174 = vsyncadd (%p42_p1), [#allocation7], 4294966912  ;;  %v1198_v0 = vmov 21   ;;  %v1199_v1 = vmov 20   ;;  %v1330_v2 = vld [vmem:[#allocation6 + $0x10] sm:$0xf] }
  0x31   : > { %958 = vset.pattern.permute.xlu1 %v1198_v0  ;;  %957 = vset.pattern.permute.xlu0 %v1199_v1  ;;  %v1334_v3 = vld [vmem:[#allocation6 + $0x8] sm:$0xff]  ;;  %v1337_v4 = vld [vmem:[#allocation6] sm:$0xff]  ;;  %v211_v5 = vld [vmem:[%s177_s11] sm:$0xff]  ;;  %vm347_vm0 = vcmask 1043456   ;;  %v1200_v23 = vmov 22   ;;  %vm340_vm1 = vcmask 162816  }
  0x32   : > { %960 = vset.pattern.permute.xlu2 %v1198_v0  ;;  %277 = vperm.xlu1 %958, %v1330_v2   ;;  %v228_v6 = vperm.slane %v211_v5, 0  ;;  %v229_v7 = vperm.slane %v211_v5, 1  ;;  %v230_v8 = vperm.slane %v211_v5, 2  ;;  %v231_v9 = vperm.slane %v211_v5, 3  ;;  %s712_s21 = sld [smem:[#allocation2]]  ;;  %s891_s4 = sshll.u32 %s1249_s20, 3 }
  0x33   : > { %224 = vperm.xlu0 %957, %v1330_v2   ;;  %273 = vperm.xlu2 %960, %v1334_v3   ;;  %v1350_v22 = vperm.slane %v211_v5, 4  ;;  %v233_v31 = vperm.slane %v211_v5, 5  ;;  %v1357_v32 = vperm.slane %v211_v5, 6  ;;  %v235_v42 = vperm.slane %v211_v5, 7  ;;  %s763_s2 = scalar_lea.hbm %s1562_s3, %s891_s4  ;;  %s205_s20 = scalar_lea.vmem [#allocation8], %s855_s9 }
  0x34   : > { %v1201_v5 = vmov 23   ;;  %vm737_vm2 = vcmask 1040384   ;;  %vm739_vm3 = vcmask 1042434   ;;  %vm741_vm4 = vcmask 1041408   ;;  %s765_s18 = sshll.u32 %s205_s20, 4  ;;  %s767_s19 = sshll.u32 %s763_s2, 4  ;;  %s766_s18 = int_to_ptr.vmem [resolvable:$true] %s765_s18  ;;  %s768_s19 = int_to_ptr.hbm [resolvable:$true] %s767_s19 }
  0x35   : > { %vm743_vm5 = vcmask 1044484   ;;  %vm745_vm6 = vcmask 1046534   ;;  %vm747_vm7 = vcmask 1045508   ;;  %s753_s22 = scalar_lea.sflag [#allocation5], %s1316_s6  ;;  %s1137_s23 = sshra.s32 %s768_s19, 4  ;;  %s1138_s23 = int_to_ptr.hbm [resolvable:$true] %s1137_s23 }
  0x36   : > { %s1139_s24 = scalar_lea.hbm %s1138_s23, 8  ;;  %s1143_s28 = scalar_lea.hbm %s1562_s3, 16 }
  0x37   : > { %p1140_p1 = scmp.ne.s32.totalorder %s1138_s23, %s1139_s24  ;;  %p1144_p12 = scmp.lt.s32.totalorder %s1138_s23, %s1562_s3 }
  0x38   : > { %p1145_p8 = scmp.lt.s32.totalorder %s1143_s28, %s1139_s24 }
  0x39   : > { %p1141_p3 = pnand %p1140_p1, %p1285_p13 }
  0x3a   : > { %959 = vset.pattern.permute.xlu1 %v1199_v1  ;;  %p1146_p7 = por %p1145_p8, %p1144_p12 }
  0x3b   : > { %219 = vperm.xlu0 %957, %v1334_v3   ;;  %214 = vperm.xlu1 %959, %v1337_v4   ;;  %p1142_p5 = pneg %p1141_p3 }
  0x3c   : > { %269 = vperm.xlu2 %960, %v1337_v4  }
  0x3d   : > { %p1147_p9 = pnand %p1146_p7, %p1142_p5 }
  0x43   : > { %961 = vset.pattern.permute.xlu0 %v1200_v23  ;;  %962 = vset.pattern.permute.xlu1 %v1200_v23 }
  0x44   : > { %329 = vperm.xlu0 %961, %v1337_v4   ;;  %333 = vperm.xlu1 %962, %v1334_v3  }
  0x45   : > { %963 = vset.pattern.permute.xlu2 %v1200_v23 }
  0x46   : > { %337 = vperm.xlu2 %963, %v1330_v2  }
  0x4c   : > { %964 = vset.pattern.permute.xlu1 %v1201_v5  ;;  %966 = vset.pattern.permute.xlu0 %v1201_v5 }
  0x4d   : > { %605 = vperm.xlu1 %964, %v1337_v4   ;;  %613 = vperm.xlu0 %966, %v1330_v2  }
  0x4e   : > { %965 = vset.pattern.permute.xlu2 %v1201_v5 }
  0x4f   : > { %609 = vperm.xlu2 %965, %v1334_v3  }
  0x8d   : > { %v1344_v16 = vpop.permute.xlu2 %273 }
  0x96   : > { %v1364_v39 = vpop.permute.xlu2 %269 }
  0xa4   : > { %v1342_v11 = vpop.permute.xlu1 %277 }
  0xa5   : > { %v225_v10 = vpop.permute.xlu0 %224 }
  0xa6   : > { %v260_v12 = vmul.f32 %v228_v6, %v225_v10  ;;  %v261_v13 = vmul.f32 %v229_v7, %v225_v10  ;;  %v262_v14 = vmul.f32 %v230_v8, %v225_v10  ;;  %v263_v15 = vmul.f32 %v231_v9, %v225_v10 }
  0xa7   : > { %v264_v45 = vmul.f32 %v1350_v22, %v225_v10  ;;  %v265_v48 = vmul.f32 %v233_v31, %v225_v10  ;;  %v266_v50 = vmul.f32 %v1357_v32, %v225_v10  ;;  %v267_v52 = vmul.f32 %v235_v42, %v225_v10 }
  0xa8   : > { %v296_v17 = vadd.f32 %v1342_v11, %v260_v12  ;;  %v297_v18 = vadd.f32 %v1342_v11, %v261_v13  ;;  %v298_v19 = vadd.f32 %v1342_v11, %v262_v14  ;;  %v299_v20 = vadd.f32 %v1342_v11, %v263_v15 }
  0xa9   : > { %v300_v53 = vadd.f32 %v1342_v11, %v264_v45  ;;  %v301_v55 = vadd.f32 %v1342_v11, %v265_v48  ;;  %v302_v58 = vadd.f32 %v1342_v11, %v266_v50  ;;  %v303_v61 = vadd.f32 %v1342_v11, %v267_v52 }
  0xaa   : > { %967 = vtanh.f32 %v296_v17 }
  0xab   : > { %969 = vtanh.f32 %v297_v18 }
  0xac   : > { %971 = vtanh.f32 %v298_v19 }
  0xad   : > { %v220_v21 = vpop.permute.xlu0 %219  ;;  %973 = vtanh.f32 %v299_v20  ;;  %v1352_v24 = vpop.permute.xlu1 %214 }
  0xae   : > { %v252_v25 = vmul.f32 %v228_v6, %v220_v21  ;;  %v253_v26 = vmul.f32 %v229_v7, %v220_v21  ;;  %v254_v27 = vmul.f32 %v230_v8, %v220_v21  ;;  %v255_v28 = vmul.f32 %v231_v9, %v220_v21 }
  0xaf   : > { %v244_v29 = vmul.f32 %v228_v6, %v1352_v24  ;;  %v245_v30 = vmul.f32 %v229_v7, %v1352_v24  ;;  %v246_v37 = vmul.f32 %v230_v8, %v1352_v24  ;;  %v247_v41 = vmul.f32 %v231_v9, %v1352_v24 }
  0xb0   : > { %v968_v33 = vpop.eup %967  ;;  %v288_v34 = vadd.f32 %v1344_v16, %v252_v25  ;;  %v289_v35 = vadd.f32 %v1344_v16, %v253_v26  ;;  %v290_v36 = vadd.f32 %v1344_v16, %v254_v27  ;;  %v291_v40 = vadd.f32 %v1344_v16, %v255_v28 }
  0xb1   : > { %v970_v38 = vpop.eup %969  ;;  %858 = vmatpush.msk.msra.mxu0 %vm347_vm0, %v968_v33  ;;  %v280_v44 = vadd.f32 %v1364_v39, %v244_v29  ;;  %v281_v47 = vadd.f32 %v1364_v39, %v245_v30  ;;  %v282_v49 = vadd.f32 %v1364_v39, %v246_v37  ;;  %v283_v51 = vadd.f32 %v1364_v39, %v247_v41 }
  0xb2   : > { %v972_v43 = vpop.eup %971  ;;  %862 = vmatpush.msk.msra.mxu1 %vm347_vm0, %v970_v38  ;;  %975 = vtanh.f32 %v288_v34  ;;  %v256_v54 = vmul.f32 %v1350_v22, %v220_v21  ;;  %v257_v56 = vmul.f32 %v233_v31, %v220_v21  ;;  %v258_v59 = vmul.f32 %v1357_v32, %v220_v21 }
  0xb3   : > { %v974_v46 = vpop.eup %973  ;;  %866 = vmatpush.msk.msra.mxu2 %vm347_vm0, %v972_v43  ;;  %977 = vtanh.f32 %v289_v35  ;;  %v259_v62 = vmul.f32 %v235_v42, %v220_v21  ;;  %v248_v1 = vmul.f32 %v1350_v22, %v1352_v24  ;;  %v249_v8 = vmul.f32 %v233_v31, %v1352_v24 }
  0xb4   : > { %870 = vmatpush.msk.msra.mxu3 %vm347_vm0, %v974_v46  ;;  %979 = vtanh.f32 %v290_v36  ;;  %v292_v0 = vadd.f32 %v1344_v16, %v256_v54  ;;  %v293_v7 = vadd.f32 %v1344_v16, %v257_v56  ;;  %v294_v10 = vadd.f32 %v1344_v16, %v258_v59  ;;  %v1462_v46 = vpop.permute.xlu2 %337 }
  0xb5   : > { %981 = vtanh.f32 %v291_v40  ;;  %v250_v11 = vmul.f32 %v1357_v32, %v1352_v24  ;;  %v295_v13 = vadd.f32 %v1344_v16, %v259_v62  ;;  %v251_v14 = vmul.f32 %v235_v42, %v1352_v24 }
  0xb6   : > { %983 = vtanh.f32 %v280_v44  ;;  %v284_v17 = vadd.f32 %v1364_v39, %v248_v1  ;;  %v285_v16 = vadd.f32 %v1364_v39, %v249_v8  ;;  %v1454_v38 = vpop.permute.xlu0 %329 }
  0xb7   : > { %985 = vtanh.f32 %v281_v47  ;;  %v286_v20 = vadd.f32 %v1364_v39, %v250_v11  ;;  %v287_v22 = vadd.f32 %v1364_v39, %v251_v14 }
  0xb8   : > { %v976_v57 = vpop.eup %975  ;;  %987 = vtanh.f32 %v282_v49 }
  0xb9   : > { %v978_v60 = vpop.eup %977  ;;  %386 = vmatpush.msra.mxu0 %v976_v57  ;;  %989 = vtanh.f32 %v283_v51 }
  0xba   : > { %v980_v63 = vpop.eup %979  ;;  %412 = vmatpush.msra.mxu1 %v978_v60  ;;  %991 = vtanh.f32 %v300_v53 }
  0xbb   : > { %v982_v6 = vpop.eup %981  ;;  %438 = vmatpush.msra.mxu2 %v980_v63  ;;  %993 = vtanh.f32 %v301_v55 }
  0xbc   : > { %v984_v9 = vpop.eup %983  ;;  %464 = vmatpush.msra.mxu3 %v982_v6  ;;  %995 = vtanh.f32 %v302_v58  ;;  %v1474_v1 = vpop.permute.xlu2 %609 }
  0xbd   : > { %v986_v12 = vpop.eup %985  ;;  %387 = vmatpush.msra.mxu0 %v984_v9  ;;  %997 = vtanh.f32 %v303_v61 }
  0xbe   : > { %v988_v15 = vpop.eup %987  ;;  %413 = vmatpush.msra.mxu1 %v986_v12  ;;  %859 = vmatmul.msk.f32.vlgmr.msra.gmra.mxu0 %vm340_vm1, %v1337_v4  ;;  %999 = vtanh.f32 %v292_v0 }
  0xbf   : > { %v990_v18 = vpop.eup %989  ;;  %439 = vmatpush.msra.mxu2 %v988_v15  ;;  %863 = vmatmul.msk.f32.vlgmr.msra.gmra.mxu1 %vm340_vm1, %v1337_v4  ;;  %1001 = vtanh.f32 %v293_v7 }
  0xc0   : > { %v992_v19 = vpop.eup %991  ;;  %465 = vmatpush.msra.mxu3 %v990_v18  ;;  %867 = vmatmul.msk.f32.vlgmr.msra.gmra.mxu2 %vm340_vm1, %v1337_v4  ;;  %1003 = vtanh.f32 %v294_v10 }
  0xc1   : > { %v994_v21 = vpop.eup %993  ;;  %871 = vmatmul.msk.f32.vlgmr.msra.gmra.mxu3 %vm340_vm1, %v1337_v4  ;;  %874 = vmatpush.msk.msrb.mxu0 %vm347_vm0, %v992_v19  ;;  %1005 = vtanh.f32 %v295_v13  ;;  %v1477_v13 = vpop.permute.xlu0 %613 }
  0xc2   : > { %v996_v23 = vpop.eup %995  ;;  %878 = vmatpush.msk.msrb.mxu1 %vm347_vm0, %v994_v21  ;;  %1007 = vtanh.f32 %v284_v17 }
  0xc3   : > { %v998_v24 = vpop.eup %997  ;;  %882 = vmatpush.msk.msrb.mxu2 %vm347_vm0, %v996_v23  ;;  %1009 = vtanh.f32 %v285_v16 }
  0xc4   : > { %v1000_v25 = vpop.eup %999  ;;  %886 = vmatpush.msk.msrb.mxu3 %vm347_vm0, %v998_v24  ;;  %1011 = vtanh.f32 %v286_v20 }
  0xc5   : > { %v1002_v26 = vpop.eup %1001  ;;  %490 = vmatpush.msrb.mxu0 %v1000_v25  ;;  %1013 = vtanh.f32 %v287_v22 }
  0xc6   : > { %v1004_v27 = vpop.eup %1003  ;;  %516 = vmatpush.msrb.mxu1 %v1002_v26  ;;  %860 = vmatmul.msk.f32.gmra.mxu0 %vm340_vm1, %v1334_v3 }
  0xc7   : > { %v1006_v28 = vpop.eup %1005  ;;  %542 = vmatpush.msrb.mxu2 %v1004_v27  ;;  %864 = vmatmul.msk.f32.gmra.mxu1 %vm340_vm1, %v1334_v3 }
  0xc8   : > { %v1008_v29 = vpop.eup %1007  ;;  %568 = vmatpush.msrb.mxu3 %v1006_v28  ;;  %868 = vmatmul.msk.f32.gmra.mxu2 %vm340_vm1, %v1334_v3 }
  0xc9   : > { %v1010_v30 = vpop.eup %1009  ;;  %491 = vmatpush.msrb.mxu0 %v1008_v29  ;;  %872 = vmatmul.msk.f32.gmra.mxu3 %vm340_vm1, %v1334_v3 }
  0xca   : > { %v1012_v31 = vpop.eup %1011  ;;  %517 = vmatpush.msrb.mxu1 %v1010_v30 }
  0xcb   : > { %v1014_v32 = vpop.eup %1013  ;;  %543 = vmatpush.msrb.mxu2 %v1012_v31 }
  0xcc   : > { %569 = vmatpush.msrb.mxu3 %v1014_v32 }
  0xce   : > { %861 = vmatmul.msk.f32.gmra.mxu0 %vm340_vm1, %v1330_v2 }
  0xcf   : > { %865 = vmatmul.msk.f32.gmra.mxu1 %vm340_vm1, %v1330_v2 }
  0xd0   : > { %869 = vmatmul.msk.f32.gmra.mxu2 %vm340_vm1, %v1330_v2 }
  0xd1   : > { %873 = vmatmul.msk.f32.gmra.mxu3 %vm340_vm1, %v1330_v2 }
  0xd6   : > { %875 = vmatmul.msk.f32.vlgmr.msrb.gmra.mxu0 %vm340_vm1, %v1337_v4 }
  0xd7   : > { %879 = vmatmul.msk.f32.vlgmr.msrb.gmra.mxu1 %vm340_vm1, %v1337_v4 }
  0xd8   : > { %883 = vmatmul.msk.f32.vlgmr.msrb.gmra.mxu2 %vm340_vm1, %v1337_v4 }
  0xd9   : > { %887 = vmatmul.msk.f32.vlgmr.msrb.gmra.mxu3 %vm340_vm1, %v1337_v4 }
  0xde   : > { %876 = vmatmul.msk.f32.gmra.mxu0 %vm340_vm1, %v1334_v3 }
  0xdf   : > { %880 = vmatmul.msk.f32.gmra.mxu1 %vm340_vm1, %v1334_v3 }
  0xe0   : > { %884 = vmatmul.msk.f32.gmra.mxu2 %vm340_vm1, %v1334_v3 }
  0xe1   : > { %888 = vmatmul.msk.f32.gmra.mxu3 %vm340_vm1, %v1334_v3  ;;  %v1456_v3 = vpop.permute.xlu1 %333 }
  0xe6   : > { %877 = vmatmul.msk.f32.gmra.mxu0 %vm340_vm1, %v1330_v2 }
  0xe7   : > { %881 = vmatmul.msk.f32.gmra.mxu1 %vm340_vm1, %v1330_v2 }
  0xe8   : > { %885 = vmatmul.msk.f32.gmra.mxu2 %vm340_vm1, %v1330_v2 }
  0xe9   : > { %889 = vmatmul.msk.f32.gmra.mxu3 %vm340_vm1, %v1330_v2  ;;  %v1472_v0 = vpop.permute.xlu1 %605 }
 0x13b   : > { %v389_v4 = vpop.f32.mrf.mxu0 }
 0x13c   : > { %v415_v33 = vpop.f32.mrf.mxu1  ;;  %v390_v63 = vadd.f32 %v389_v4, %v1454_v38 }
 0x13d   : > { %v416_v41 = vadd.f32 %v415_v33, %v1454_v38 }
 0x13f   : > { %1015 = vtanh.f32 %v416_v41 }
 0x143   : > { %v441_v34 = vpop.f32.mrf.mxu2  ;;  %v392_v35 = vpop.f32.mrf.mxu0 }
 0x144   : > { %v467_v36 = vpop.f32.mrf.mxu3  ;;  %v418_v37 = vpop.f32.mrf.mxu1  ;;  %v442_v44 = vadd.f32 %v441_v34, %v1454_v38  ;;  %v393_v61 = vadd.f32 %v392_v35, %v1456_v3 }
 0x145   : > { %v419_v2 = vadd.f32 %v418_v37, %v1456_v3  ;;  %v468_v51 = vadd.f32 %v467_v36, %v1454_v38  ;;  %v1016_v56 = vpop.eup %1015 }
 0x146   : > { %1017 = vtanh.f32 %v442_v44  ;;  %v617_v16 = vmul.f32 %v1016_v56, %v1472_v0 }
 0x147   : > { %1019 = vtanh.f32 %v419_v2 }
 0x14b   : > { %v444_v39 = vpop.f32.mrf.mxu2  ;;  %v395_v40 = vpop.f32.mrf.mxu0 }
 0x14c   : > { %v470_v42 = vpop.f32.mrf.mxu3  ;;  %v421_v43 = vpop.f32.mrf.mxu1  ;;  %v445_v45 = vadd.f32 %v444_v39, %v1456_v3  ;;  %v396_v57 = vadd.f32 %v395_v40, %v1462_v46 }
 0x14d   : > { %v471_v47 = vadd.f32 %v470_v42, %v1456_v3  ;;  %v422_v48 = vadd.f32 %v421_v43, %v1462_v46  ;;  %v1018_v58 = vpop.eup %1017 }
 0x14e   : > { %1021 = vtanh.f32 %v445_v45  ;;  %v1020_v59 = vpop.eup %1019  ;;  %v618_v25 = vmul.f32 %v1018_v58, %v1472_v0 }
 0x14f   : > { %1023 = vtanh.f32 %v471_v47  ;;  %v625_v12 = vmul.f32 %v1020_v59, %v1474_v1 }
 0x150   : > { %1025 = vtanh.f32 %v422_v48 }
 0x151   : > { %v649_v27 = vadd.f32 %v625_v12, %v617_v16 }
 0x153   : > { %v447_v49 = vpop.f32.mrf.mxu2  ;;  %v493_v50 = vpop.f32.mrf.mxu0 }
 0x154   : > { %v448_v52 = vadd.f32 %v447_v49, %v1462_v46  ;;  %v473_v53 = vpop.f32.mrf.mxu3  ;;  %v519_v54 = vpop.f32.mrf.mxu1  ;;  %v494_v15 = vadd.f32 %v493_v50, %v1454_v38 }
 0x155   : > { %v474_v55 = vadd.f32 %v473_v53, %v1462_v46  ;;  %v1022_v60 = vpop.eup %1021  ;;  %v520_v28 = vadd.f32 %v519_v54, %v1454_v38 }
 0x156   : > { %1027 = vtanh.f32 %v448_v52  ;;  %v1024_v62 = vpop.eup %1023  ;;  %v626_v19 = vmul.f32 %v1022_v60, %v1474_v1 }
 0x157   : > { %1029 = vtanh.f32 %v474_v55  ;;  %v1026_v5 = vpop.eup %1025  ;;  %v627_v20 = vmul.f32 %v1024_v62, %v1474_v1 }
 0x158   : > { %1031 = vtanh.f32 %v468_v51  ;;  %v633_v23 = vmul.f32 %v1026_v5, %v1477_v13  ;;  %v658_v4 = vadd.f32 %v626_v19, %v618_v25 }
 0x159   : > { %1033 = vtanh.f32 %v396_v57 }
 0x15a   : > { %1035 = vtanh.f32 %v393_v61  ;;  %v650_v39 = vsel %vm347_vm0, %v633_v23, 0.0 }
 0x15b   : > { %v545_v6 = vpop.f32.mrf.mxu2  ;;  %v496_v7 = vpop.f32.mrf.mxu0  ;;  %1037 = vtanh.f32 %v390_v63  ;;  %v651_v49 = vadd.f32 %v650_v39, %v649_v27 }
 0x15c   : > { %v1028_v8 = vpop.eup %1027  ;;  %v571_v9 = vpop.f32.mrf.mxu3  ;;  %v497_v21 = vadd.f32 %v496_v7, %v1456_v3  ;;  %1039 = vtanh.f32 %v494_v15  ;;  %v546_v31 = vadd.f32 %v545_v6, %v1454_v38 }
 0x15d   : > { %v522_v10 = vpop.f32.mrf.mxu1  ;;  %v1030_v11 = vpop.eup %1029  ;;  %v634_v17 = vmul.f32 %v1028_v8, %v1477_v13  ;;  %v572_v50 = vadd.f32 %v571_v9, %v1454_v38  ;;  %v652_v60 = vrot.slane %v651_v49, 4 }
 0x15e   : > { %v1032_v14 = vpop.eup %1031  ;;  %v635_v18 = vmul.f32 %v1030_v11, %v1477_v13  ;;  %v523_v24 = vadd.f32 %v522_v10, %v1456_v3  ;;  %1041 = vtanh.f32 %v497_v21 }
 0x15f   : > { %v1034_v22 = vpop.eup %1033  ;;  %v619_v26 = vmul.f32 %v1032_v14, %v1472_v0  ;;  %v659_v29 = vsel %vm347_vm0, %v634_v17, 0.0  ;;  %v653_v17 = vadd.f32 %v652_v60, %v651_v49 }
 0x160   : > { %v668_v30 = vsel %vm347_vm0, %v635_v18, 0.0  ;;  %v1036_v32 = vpop.eup %1035  ;;  %v632_v34 = vmul.f32 %v1034_v22, %v1477_v13  ;;  %1043 = vtanh.f32 %v523_v24  ;;  %v660_v44 = vadd.f32 %v659_v29, %v658_v4 }
 0x161   : > { %v667_v33 = vadd.f32 %v627_v20, %v619_v26  ;;  %v1038_v37 = vpop.eup %1037  ;;  %1045 = vtanh.f32 %v520_v28  ;;  %v624_v47 = vmul.f32 %v1036_v32, %v1474_v1  ;;  %v654_v29 = vrot.slane %v653_v17, 2 }
 0x162   : > { %1047 = vtanh.f32 %v546_v31  ;;  %v1040_v51 = vpop.eup %1039  ;;  %v616_v52 = vmul.f32 %v1038_v37, %v1472_v0  ;;  %v641_v54 = vsel %vm347_vm0, %v632_v34, 0.0  ;;  %v661_v55 = vrot.slane %v660_v44, 4 }
 0x163   : > { %v548_v35 = vpop.f32.mrf.mxu2  ;;  %v499_v36 = vpop.f32.mrf.mxu0  ;;  %v669_v2 = vadd.f32 %v668_v30, %v667_v33  ;;  %v620_v12 = vmul.f32 %v1040_v51, %v1472_v0 }
 0x164   : > { %v549_v40 = vadd.f32 %v548_v35, %v1456_v3  ;;  %v574_v41 = vpop.f32.mrf.mxu3  ;;  %v500_v42 = vadd.f32 %v499_v36, %v1462_v46  ;;  %v1042_v53 = vpop.eup %1041  ;;  %v640_v58 = vadd.f32 %v624_v47, %v616_v52  ;;  %v662_v7 = vadd.f32 %v661_v55, %v660_v44 }
 0x165   : > { %v525_v43 = vpop.f32.mrf.mxu1  ;;  %v575_v48 = vadd.f32 %v574_v41, %v1456_v3  ;;  %v670_v56 = vrot.slane %v669_v2, 4  ;;  %v628_v62 = vmul.f32 %v1042_v53, %v1474_v1  ;;  %v655_v47 = vadd.f32 %v654_v29, %v653_v17 }
 0x166   : > { %v526_v45 = vadd.f32 %v525_v43, %v1462_v46  ;;  %1049 = vtanh.f32 %v549_v40  ;;  %v1044_v57 = vpop.eup %1043  ;;  %v642_v38 = vadd.f32 %v641_v54, %v640_v58  ;;  %v663_v23 = vrot.slane %v662_v7, 2 }
 0x167   : > { %1051 = vtanh.f32 %v500_v42  ;;  %v1046_v59 = vpop.eup %1045  ;;  %v671_v8 = vadd.f32 %v670_v56, %v669_v2  ;;  %v629_v9 = vmul.f32 %v1044_v57, %v1474_v1  ;;  %v676_v20 = vadd.f32 %v628_v62, %v620_v12 }
 0x168   : > { %1053 = vtanh.f32 %v526_v45  ;;  %v1048_v61 = vpop.eup %1047  ;;  %v621_v15 = vmul.f32 %v1046_v59, %v1472_v0  ;;  %v643_v19 = vrot.slane %v642_v38, 4  ;;  %v664_v40 = vadd.f32 %v663_v23, %v662_v7 }
 0x169   : > { %1055 = vtanh.f32 %v575_v48  ;;  %v672_v24 = vrot.slane %v671_v8, 2  ;;  %v622_v33 = vmul.f32 %v1048_v61, %v1472_v0 }
 0x16a   : > { %1057 = vtanh.f32 %v572_v50  ;;  %v644_v4 = vadd.f32 %v643_v19, %v642_v38  ;;  %v665_v53 = vrot.slane %v664_v40, 1 }
 0x16b   : > { %v551_v3 = vpop.f32.mrf.mxu2  ;;  %v673_v41 = vadd.f32 %v672_v24, %v671_v8 }
 0x16c   : > { %v552_v63 = vadd.f32 %v551_v3, %v1462_v46  ;;  %v577_v5 = vpop.f32.mrf.mxu3  ;;  %v1050_v6 = vpop.eup %1049  ;;  %v645_v48 = vrot.slane %v644_v4, 2  ;;  %v666_v62 = vadd.f32 %v665_v53, %v664_v40 }
 0x16d   : > { %v578_v10 = vadd.f32 %v577_v5, %v1462_v46  ;;  %v1052_v11 = vpop.eup %1051  ;;  %v685_v46 = vadd.f32 %v629_v9, %v621_v15  ;;  %v630_v26 = vmul.f32 %v1050_v6, %v1474_v1  ;;  %v674_v54 = vrot.slane %v673_v41, 1 }
 0x16e   : > { %1059 = vtanh.f32 %v552_v63  ;;  %v1054_v14 = vpop.eup %1053  ;;  %v636_v18 = vmul.f32 %v1052_v11, %v1477_v13  ;;  %v646_v3 = vadd.f32 %v645_v48, %v644_v4 }
 0x16f   : > { %1061 = vtanh.f32 %v578_v10  ;;  %v1056_v16 = vpop.eup %1055  ;;  %v637_v21 = vmul.f32 %v1054_v14, %v1477_v13  ;;  %v694_v42 = vadd.f32 %v630_v26, %v622_v33  ;;  %v675_v63 = vadd.f32 %v674_v54, %v673_v41 }
 0x170   : > { %v1058_v22 = vpop.eup %1057  ;;  %v677_v25 = vsel %vm347_vm0, %v636_v18, 0.0  ;;  %v631_v30 = vmul.f32 %v1056_v16, %v1474_v1  ;;  %v713_v10 = vstv %s712_s21  ;;  %v647_v14 = vrot.slane %v646_v3, 1 }
 0x171   : > { %v678_v27 = vadd.f32 %v677_v25, %v676_v20  ;;  %v686_v28 = vsel %vm347_vm0, %v637_v21, 0.0  ;;  %v623_v34 = vmul.f32 %v1058_v22, %v1472_v0  ;;  %v716_v15 = vadd.f32 %v713_v10, %v666_v62 }
 0x172   : > { %v687_v31 = vadd.f32 %v686_v28, %v685_v46  ;;  %v717_v17 = vadd.f32 %v713_v10, %v675_v63  ;;  %v648_v24 = vadd.f32 %v647_v14, %v646_v3 }
 0x173   : > { %v679_v35 = vrot.slane %v678_v27, 4  ;;  %v703_v2 = vadd.f32 %v631_v30, %v623_v34  ;;  %v731_v46 = vrot.slane %v716_v15, 6 }
 0x174   : > { %v1060_v32 = vpop.eup %1059  ;;  %v688_v37 = vrot.slane %v687_v31, 4  ;;  %v732_v25 = vrot.slane %v717_v17, 5 }
 0x175   : > { %v1062_v36 = vpop.eup %1061  ;;  %v638_v39 = vmul.f32 %v1060_v32, %v1477_v13  ;;  %v680_v43 = vadd.f32 %v679_v35, %v678_v27  ;;  %v714_v32 = vadd.f32 %v713_v10, %v648_v24 }
 0x176   : > { %v639_v44 = vmul.f32 %v1062_v36, %v1477_v13  ;;  %v689_v1 = vadd.f32 %v688_v37, %v687_v31  ;;  %v656_v13 = vrot.slane %v655_v47, 1  ;;  %v740_v33 = vsel %vm739_vm3, %v731_v46, %v732_v25 }
 0x177   : > { %v695_v45 = vsel %vm347_vm0, %v638_v39, 0.0  ;;  %v681_v49 = vrot.slane %v680_v43, 2 }
 0x178   : > { %v696_v0 = vadd.f32 %v695_v45, %v694_v42  ;;  %v704_v50 = vsel %vm347_vm0, %v639_v44, 0.0  ;;  %v690_v51 = vrot.slane %v689_v1, 2  ;;  %v657_v9 = vadd.f32 %v656_v13, %v655_v47 }
 0x179   : > { %v705_v52 = vadd.f32 %v704_v50, %v703_v2  ;;  %v682_v55 = vadd.f32 %v681_v49, %v680_v43 }
 0x17a   : > { %v697_v56 = vrot.slane %v696_v0, 4  ;;  %v691_v57 = vadd.f32 %v690_v51, %v689_v1  ;;  %v715_v19 = vadd.f32 %v713_v10, %v657_v9 }
 0x17b   : > { %v706_v58 = vrot.slane %v705_v52, 4  ;;  %v683_v59 = vrot.slane %v682_v55, 1 }
 0x17c   : > { %v698_v60 = vadd.f32 %v697_v56, %v696_v0  ;;  %v692_v61 = vrot.slane %v691_v57, 1  ;;  %v730_v28 = vrot.slane %v715_v19, 7 }
 0x17d   : > { %v707_v38 = vadd.f32 %v706_v58, %v705_v52  ;;  %v684_v6 = vadd.f32 %v683_v59, %v682_v55 }
 0x17e   : > { %v699_v5 = vrot.slane %v698_v60, 2  ;;  %v693_v7 = vadd.f32 %v692_v61, %v691_v57  ;;  %v738_v34 = vsel %vm737_vm2, %v714_v32, %v730_v28 }
 0x17f   : > { %v708_v8 = vrot.slane %v707_v38, 2  ;;  %v718_v20 = vadd.f32 %v713_v10, %v684_v6  ;;  %v742_v37 = vsel %vm741_vm4, %v738_v34, %v740_v33 }
 0x180   : > { %v700_v11 = vadd.f32 %v699_v5, %v698_v60  ;;  %v719_v21 = vadd.f32 %v713_v10, %v693_v7 }
 0x181   : > { %v709_v12 = vadd.f32 %v708_v8, %v707_v38  ;;  %v733_v29 = vrot.slane %v718_v20, 4 }
 0x182   : > { %v701_v18 = vrot.slane %v700_v11, 1  ;;  %v734_v30 = vrot.slane %v719_v21, 3 }
 0x183   : > { %v710_v16 = vrot.slane %v709_v12, 1 }
 0x184   : > { %v702_v22 = vadd.f32 %v701_v18, %v700_v11  ;;  %v744_v35 = vsel %vm743_vm5, %v733_v29, %v734_v30 }
 0x185   : > { %v711_v23 = vadd.f32 %v710_v16, %v709_v12 }
 0x186   : > { %v720_v26 = vadd.f32 %v713_v10, %v702_v22 }
 0x187   : > { %v721_v27 = vadd.f32 %v713_v10, %v711_v23 }
 0x188   : > { %v735_v31 = vrot.slane %v720_v26, 2 }
 0x189   : > { %v736_v4 = vrot.slane %v721_v27, 1 }
 0x18b   : > { %v746_v36 = vsel %vm745_vm6, %v735_v31, %v736_v4 }
 0x18c   : > { %v748_v39 = vsel %vm747_vm7, %v744_v35, %v746_v36 }
 0x18d   : > { %v749_v40 = vsel %vm347_vm0, %v742_v37, %v748_v39 }
 0x18e   : > { %751 = vst [vmem:[%s205_s20] sm:$0xff] %v749_v40 }
 0x18f   : > { %1150 = shalt.err (!%p1147_p9)
}
 0x190   : > { %900 = dma.vmem_to_hbm [thread:$0]  (%p1285_p13), %s766_s18, 128, %s768_s19, %s753_s22  }
 0x191 PF: > { %s779_s6 = sand.u32 1, %s1181_s14   ;;  %p1568_p10 = scmp.ge.s32.totalorder %s1193_s17, 2 }
 0x192   : > { %s780_s9 = scalar_lea.sflag [#allocation5], %s779_s6 }
 0x193   : > { %p911_p11 = pnand %p1568_p10, %p1290_p4 }
 0x195   : > { %p912_p0 = pneg %p911_p11 }
 0x197   : > { %1176 = dma.done.wait (%p912_p0), %s780_s9, 128  }
 0x198   : > { %1178 = vsyncadd (%p912_p0), %s780_s9, 4294967168  ;;  %p18_p2 = scmp.ge.s32.totalorder %s1265_s27, 4   ;;  %s1569_s14 = smov %s1185_s15 }
 0x199   : > { %s1570_s15 = smov %s1189_s16  ;;  %s1571_s16 = smov %s1277_s30 }
 0x19a   : > { %s1572_s17 = smov %s1265_s27  ;;  %20 = sbr.rel (!%p18_p2) target bundleno = 8 (0x8), region = 81 }
 0x19f   :  { %786 = vsyncpa [#allocation4], 1 }
 0x1a0   :  { %788 = vsyncpa [#allocation4 + $0x1], 1 }
 0x1a1   :  { %789 = vsyncpa [#allocation7], 1 }
 0x1a2   :  { %790 = vsyncpa [#allocation5], 1 }
 0x1a3   :  { %792 = vsyncpa [#allocation5 + $0x1], 1 }

</bundles_post_ra>
